<compile_context>
chip_gen: v7x
topology: tpu7x:2x2x1
jax: 0.10.0
libtpu: 0.0.40
codegen_flags: <defaults>
</compile_context>

<pallas_src>
import jax
import jax.numpy as jnp
from jax.experimental import pallas as pl
from jax.experimental.pallas import tpu as pltpu


def res_layer_kernel(x_ref, w1_ref, b1_ref, w2_ref, b2_ref, o_ref):
    x = x_ref[...]                                     # (tm, D) f32
    # First linear + ReLU. MXU consumes bf16 operands, accumulates in f32.
    y = jnp.dot(x.astype(jnp.bfloat16), w1_ref[...],
                preferred_element_type=jnp.float32)
    y = jnp.maximum(y + b1_ref[...], 0.0)
    # TODO(synk): nn.Dropout() is the identity in eval mode; training-mode
    # dropout masking is not implemented here.
    # Second linear + ReLU.
    y = jnp.dot(y.astype(jnp.bfloat16), w2_ref[...],
                preferred_element_type=jnp.float32)
    y = jnp.maximum(y + b2_ref[...], 0.0)
    # Residual add in f32.
    o_ref[...] = (x + y).astype(o_ref.dtype)


def prepare_params(w1, b1, w2, b2):
    """One-time parameter prep (do NOT call per forward pass):
    transpose PyTorch [out, in] weights to [in, out], downcast them to bf16,
    and reshape biases to (1, D) f32 rows."""
    D = w1.shape[0]
    w1_t = jnp.asarray(w1, jnp.float32).T.astype(jnp.bfloat16)
    w2_t = jnp.asarray(w2, jnp.float32).T.astype(jnp.bfloat16)
    b1_r = jnp.asarray(b1, jnp.float32).reshape(1, D)
    b2_r = jnp.asarray(b2, jnp.float32).reshape(1, D)
    return w1_t, b1_r, w2_t, b2_r


def _pick_tm(B):
    """Largest sensible batch tile: whole batch if small, else the biggest
    power-of-two (multiple of 8) <= 512 dividing B."""
    if B <= 512:
        return B                       # block == full dim (always legal)
    for cand in (512, 256, 128, 64, 32, 16, 8):
        if B % cand == 0:
            return cand
    return B                           # odd batch: single full-batch tile


def res_layer(x, w1_t, b1, w2_t, b2, *, tm=None):
    """x: [B, D] f32; w1_t, w2_t: [D, D] bf16 (pre-transposed to [in, out]);
    b1, b2: (1, D) f32 rows — see prepare_params()."""
    B, D = x.shape
    if tm is None:
        tm = _pick_tm(B)
    assert B % tm == 0, (B, tm)

    # VMEM budget: double-buffered f32 x/out tiles + double-buffered bf16
    # weights + padded biases, with 2x headroom (clamped to fit v7x's 64 MiB).
    needed = (2 * 2 * tm * D * 4              # x + out tiles, f32, 2 buffers
              + 2 * 2 * D * D * 2             # two bf16 weights, 2 buffers
              + 2 * 2 * 8 * max(D, 128) * 4)  # biases, sublane/lane padded
    vmem_limit = int(min(max(2 * needed, 32 << 20), 48 << 20))

    grid = (B // tm,)
    return pl.pallas_call(
        res_layer_kernel,
        out_shape=jax.ShapeDtypeStruct((B, D), x.dtype),
        grid_spec=pltpu.PrefetchScalarGridSpec(
            num_scalar_prefetch=0,
            grid=grid,
            in_specs=[
                pl.BlockSpec((tm, D), lambda i: (i, 0)),   # x tile (f32)
                pl.BlockSpec((D, D), lambda i: (0, 0)),    # W1^T resident (bf16)
                pl.BlockSpec((1, D), lambda i: (0, 0)),    # b1 (f32)
                pl.BlockSpec((D, D), lambda i: (0, 0)),    # W2^T resident (bf16)
                pl.BlockSpec((1, D), lambda i: (0, 0)),    # b2 (f32)
            ],
            out_specs=pl.BlockSpec((tm, D), lambda i: (i, 0)),
        ),
        # NOTE: if the caller never reuses x after this layer, adding
        # input_output_aliases={0: 0} saves a separate HBM output allocation;
        # left off here because the demo below reuses x for verification.
        compiler_params=pltpu.CompilerParams(
            dimension_semantics=("parallel",),   # batch tiles shard across TCs on v7x
            vmem_limit_bytes=vmem_limit,
        ),
    )(x, w1_t, b1, w2_t, b2)


def res_layer_ref(x, w1, b1, w2, b2):
    y = jnp.maximum(x @ w1.T + b1, 0.0)
    y = jnp.maximum(y @ w2.T + b2, 0.0)
    return x + y


if __name__ == "__main__":
    # Small shapes consistent with the module: linear_size = 128.
    B, D = 64, 128
    key = jax.random.PRNGKey(0)
    kx, kw1, kb1, kw2, kb2 = jax.random.split(key, 5)

    x = jax.random.normal(kx, (B, D), dtype=jnp.float32)
    # nn.Linear default init scale ~ 1/sqrt(fan_in); deterministic synthetic params.
    bound = 1.0 / (D ** 0.5)
    w1 = jax.random.uniform(kw1, (D, D), jnp.float32, -bound, bound)
    b1 = jax.random.uniform(kb1, (D,), jnp.float32, -bound, bound)
    w2 = jax.random.uniform(kw2, (D, D), jnp.float32, -bound, bound)
    b2 = jax.random.uniform(kb2, (D,), jnp.float32, -bound, bound)

    # One-time parameter prep (transpose + bf16 downcast) hoisted out of the
    # per-call forward path.
    w1_t, b1_r, w2_t, b2_r = prepare_params(w1, b1, w2, b2)

    ref = res_layer_ref(x, w1, b1, w2, b2)

    # 1) Auto-selected tile (whole batch in one grid step).
    out = jax.block_until_ready(res_layer(x, w1_t, b1_r, w2_t, b2_r))
    assert out.shape == (B, D)
    assert jnp.allclose(out, ref, atol=2e-2, rtol=2e-2), \
        float(jnp.max(jnp.abs(out - ref)))

    # 2) Explicit smaller tile -> multi-step pipelined grid path.
    out2 = jax.block_until_ready(res_layer(x, w1_t, b1_r, w2_t, b2_r, tm=16))
    assert jnp.allclose(out2, ref, atol=2e-2, rtol=2e-2), \
        float(jnp.max(jnp.abs(out2 - ref)))

    print("KERNEL_OK")
</pallas_src>

<mosaic_0001>
module attributes {stable_mosaic.version = 11 : i64} {
  func.func @res_layer_kernel(%arg0: i32, %arg1: memref<64x128xf32, #tpu.memory_space<vmem>>, %arg2: memref<128x128xbf16, #tpu.memory_space<vmem>>, %arg3: memref<1x128xf32, #tpu.memory_space<vmem>>, %arg4: memref<128x128xbf16, #tpu.memory_space<vmem>>, %arg5: memref<1x128xf32, #tpu.memory_space<vmem>>, %arg6: memref<64x128xf32, #tpu.memory_space<vmem>>) attributes {dimension_semantics = [#tpu.dimension_semantics<parallel>], iteration_bounds = array<i64: 1>, scalar_prefetch = 0 : i64, scratch_operands = 0 : i64, tpu.core_type = #tpu.core_type<tc>, window_params = [{transform_indices = @transform_0, window_bounds = array<i64: 64, 128>}, {pipeline_mode = #tpu.pipeline_mode<synchronous>, transform_indices = @transform_1, window_bounds = array<i64: 128, 128>}, {pipeline_mode = #tpu.pipeline_mode<synchronous>, transform_indices = @transform_2, window_bounds = array<i64: 1, 128>}, {pipeline_mode = #tpu.pipeline_mode<synchronous>, transform_indices = @transform_3, window_bounds = array<i64: 128, 128>}, {pipeline_mode = #tpu.pipeline_mode<synchronous>, transform_indices = @transform_4, window_bounds = array<i64: 1, 128>}, {transform_indices = @transform_5, window_bounds = array<i64: 64, 128>}]} {
    %c0 = arith.constant 0 : index
    %c0_0 = arith.constant 0 : index
    %0 = vector.load %arg1[%c0, %c0_0] : memref<64x128xf32, #tpu.memory_space<vmem>>, vector<64x128xf32>
    %1 = arith.truncf %0 : vector<64x128xf32> to vector<64x128xbf16>
    %c0_1 = arith.constant 0 : index
    %c0_2 = arith.constant 0 : index
    %2 = vector.load %arg2[%c0_1, %c0_2] : memref<128x128xbf16, #tpu.memory_space<vmem>>, vector<128x128xbf16>
    %cst = arith.constant dense<0.000000e+00> : vector<64x128xf32>
    %3 = tpu.matmul %1, %2, %cst {dimension_numbers = #tpu.dot_dimension_numbers<[1], [0], [0], [1], [0, 0, 1, 1], [], []>} : vector<64x128xbf16>, vector<128x128xbf16>, vector<64x128xf32> -> vector<64x128xf32>
    %c0_3 = arith.constant 0 : index
    %c0_4 = arith.constant 0 : index
    %4 = vector.load %arg3[%c0_3, %c0_4] : memref<1x128xf32, #tpu.memory_space<vmem>>, vector<1x128xf32>
    %5 = vector.broadcast %4 : vector<1x128xf32> to vector<64x128xf32>
    %6 = arith.addf %3, %5 : vector<64x128xf32>
    %cst_5 = arith.constant 0.000000e+00 : f32
    %7 = vector.broadcast %cst_5 : f32 to vector<64x128xf32>
    %8 = arith.maximumf %6, %7 : vector<64x128xf32>
    %9 = arith.truncf %8 : vector<64x128xf32> to vector<64x128xbf16>
    %c0_6 = arith.constant 0 : index
    %c0_7 = arith.constant 0 : index
    %10 = vector.load %arg4[%c0_6, %c0_7] : memref<128x128xbf16, #tpu.memory_space<vmem>>, vector<128x128xbf16>
    %cst_8 = arith.constant dense<0.000000e+00> : vector<64x128xf32>
    %11 = tpu.matmul %9, %10, %cst_8 {dimension_numbers = #tpu.dot_dimension_numbers<[1], [0], [0], [1], [0, 0, 1, 1], [], []>} : vector<64x128xbf16>, vector<128x128xbf16>, vector<64x128xf32> -> vector<64x128xf32>
    %c0_9 = arith.constant 0 : index
    %c0_10 = arith.constant 0 : index
    %12 = vector.load %arg5[%c0_9, %c0_10] : memref<1x128xf32, #tpu.memory_space<vmem>>, vector<1x128xf32>
    %13 = vector.broadcast %12 : vector<1x128xf32> to vector<64x128xf32>
    %14 = arith.addf %11, %13 : vector<64x128xf32>
    %cst_11 = arith.constant 0.000000e+00 : f32
    %15 = vector.broadcast %cst_11 : f32 to vector<64x128xf32>
    %16 = arith.maximumf %14, %15 : vector<64x128xf32>
    %17 = arith.addf %0, %16 : vector<64x128xf32>
    %c0_12 = arith.constant 0 : index
    %c0_13 = arith.constant 0 : index
    %18 = vector.load %arg6[%c0_12, %c0_13] : memref<64x128xf32, #tpu.memory_space<vmem>>, vector<64x128xf32>
    tpu.vector_store %arg6[%c0_12, %c0_13], %17 {strides = array<i32>} : memref<64x128xf32, #tpu.memory_space<vmem>>, vector<64x128xf32>,
    return
  }
  func.func @transform_0(%arg0: i32) -> (i32, i32) {
    %c0_i32 = arith.constant 0 : i32
    %c0_i32_0 = arith.constant 0 : i32
    return %arg0, %c0_i32 : i32, i32
  }
  func.func @transform_1(%arg0: i32) -> (i32, i32) {
    %c0_i32 = arith.constant 0 : i32
    %c0_i32_0 = arith.constant 0 : i32
    %c0_i32_1 = arith.constant 0 : i32
    return %c0_i32, %c0_i32_0 : i32, i32
  }
  func.func @transform_2(%arg0: i32) -> (i32, i32) {
    %c0_i32 = arith.constant 0 : i32
    %c0_i32_0 = arith.constant 0 : i32
    %c0_i32_1 = arith.constant 0 : i32
    return %c0_i32, %c0_i32_0 : i32, i32
  }
  func.func @transform_3(%arg0: i32) -> (i32, i32) {
    %c0_i32 = arith.constant 0 : i32
    %c0_i32_0 = arith.constant 0 : i32
    %c0_i32_1 = arith.constant 0 : i32
    return %c0_i32, %c0_i32_0 : i32, i32
  }
  func.func @transform_4(%arg0: i32) -> (i32, i32) {
    %c0_i32 = arith.constant 0 : i32
    %c0_i32_0 = arith.constant 0 : i32
    %c0_i32_1 = arith.constant 0 : i32
    return %c0_i32, %c0_i32_0 : i32, i32
  }
  func.func @transform_5(%arg0: i32) -> (i32, i32) {
    %c0_i32 = arith.constant 0 : i32
    %c0_i32_0 = arith.constant 0 : i32
    return %arg0, %c0_i32 : i32, i32
  }
}

</mosaic_0001>

<bundles_post_ra>
// kernel: tpu_custom_call.1
= control target key start
LH: loop header
LB: loop body
LE: loop exit
PB: predicated region body
PF: predicated region fallthrough
CT: control target
= control target key end

     0   :  { %10 = vsyncpa [#allocation3], 0  ;;  %s745_s0 = inlined_call_operand.hbm [shape: f32[64,128], index: 0, kind: input, shape index: {}]   ;;  %s746_s1 = inlined_call_operand.hbm [shape: bf16[128,128], index: 1, kind: input, shape index: {}]   ;;  %s747_s2 = inlined_call_operand.vmem [shape: f32[1,128], index: 2, kind: input, shape index: {}]   ;;  %s748_s3 = inlined_call_operand.hbm [shape: bf16[128,128], index: 3, kind: input, shape index: {}]   ;;  %s749_s4 = inlined_call_operand.vmem [shape: f32[1,128], index: 4, kind: input, shape index: {}]   ;;  %s750_s5 = inlined_call_operand.hbm [shape: f32[64,128], index: 5, kind: output, shape index: {}]  }
   0x1   :  { %11 = vsyncpa [#allocation6], 0 }
   0x2   :  { %12 = vsyncpa [#allocation4], 0  ;;  %s609_s18 = smov [#allocation5]   ;;  %s515_s22 = scalar_lea.hbm %s746_s1, 1024 }
   0x3   :  { %s30_s19 = sshll.u32 %s609_s18, 4  ;;  %p516_p0 = scmp.ne.s32.totalorder %s746_s1, %s515_s22  ;;  %s31_s19 = int_to_ptr.vmem [resolvable:$true] %s30_s19 }
   0x4   :  { %p519_p1 = scmp.lt.u32.totalorder %s515_s22, %s746_s1 }
   0x6   :  { %p521_p2 = pnand %p519_p1, %p516_p0 }
   0x8   :  { %524 = shalt.err (!%p521_p2)
}
   0x9   :  { %s525_s27 = scalar_lea.vmem %s31_s19, 1024  ;;  %p530_p4 = scmp.lt.s32.totalorder %s31_s19, %s31_s19 }
   0xa   :  { %p526_p3 = scmp.ne.s32.totalorder %s31_s19, %s525_s27  ;;  %p531_p5 = scmp.lt.s32.totalorder %s525_s27, %s525_s27 }
   0xc   :  { %p532_p6 = por %p531_p5, %p530_p4 }
   0xe   :  { %p533_p7 = pnand %p532_p6, %p526_p3 }
  0x10   :  { %536 = shalt.err (!%p533_p7)
}
  0x11   :  { %s610_s28 = smov 64   ;;  %s611_s29 = smov 4  }
  0x12   :  { %36 = dma.hbm_to_vmem [thread:$0]  %s746_s1, 1024, %s31_s19, [#allocation6], %s610_s28, %s610_s28, %s611_s29  }
  0x13   :  { %s612_s7 = smov [#allocation2]   ;;  %s537_s11 = scalar_lea.hbm %s745_s0, 1024 }
  0x14   :  { %s18_s8 = sshll.u32 %s612_s7, 4  ;;  %p538_p8 = scmp.ne.s32.totalorder %s745_s0, %s537_s11  ;;  %s19_s8 = int_to_ptr.vmem [resolvable:$true] %s18_s8 }
  0x15   :  { %p541_p9 = scmp.lt.u32.totalorder %s537_s11, %s745_s0 }
  0x17   :  { %p543_p10 = pnand %p541_p9, %p538_p8 }
  0x19   :  { %546 = shalt.err (!%p543_p10)
}
  0x1a   :  { %s547_s16 = scalar_lea.vmem %s19_s8, 1024  ;;  %p552_p12 = scmp.lt.s32.totalorder %s19_s8, %s19_s8 }
  0x1b   :  { %p548_p11 = scmp.ne.s32.totalorder %s19_s8, %s547_s16  ;;  %p553_p13 = scmp.lt.s32.totalorder %s547_s16, %s547_s16 }
  0x1d   :  { %p554_p0 = por %p553_p13, %p552_p12 }
  0x1f   :  { %p555_p1 = pnand %p554_p0, %p548_p11 }
  0x21   :  { %558 = shalt.err (!%p555_p1)
}
  0x22   :  { %s613_s1 = smov 128   ;;  %s614_s17 = smov 8  }
  0x23   :  { %24 = dma.hbm_to_vmem [thread:$0]  %s745_s0, 1024, %s19_s8, [#allocation3], %s613_s1, %s613_s1, %s614_s17  }
  0x24   :  { %s615_s20 = smov [#allocation7]   ;;  %s559_s24 = scalar_lea.hbm %s748_s3, 1024 }
  0x25   :  { %s44_s21 = sshll.u32 %s615_s20, 4  ;;  %p560_p2 = scmp.ne.s32.totalorder %s748_s3, %s559_s24  ;;  %s45_s21 = int_to_ptr.vmem [resolvable:$true] %s44_s21 }
  0x26   :  { %p563_p3 = scmp.lt.u32.totalorder %s559_s24, %s748_s3 }
  0x28   :  { %p565_p4 = pnand %p563_p3, %p560_p2 }
  0x2a   :  { %568 = shalt.err (!%p565_p4)
}
  0x2b   :  { %s569_s6 = scalar_lea.vmem %s45_s21, 1024  ;;  %p574_p6 = scmp.lt.s32.totalorder %s45_s21, %s45_s21 }
  0x2c   :  { %p570_p5 = scmp.ne.s32.totalorder %s45_s21, %s569_s6  ;;  %p575_p7 = scmp.lt.s32.totalorder %s569_s6, %s569_s6 }
  0x2e   :  { %p576_p8 = por %p575_p7, %p574_p6 }
  0x30   :  { %p577_p9 = pnand %p576_p8, %p570_p5 }
  0x32   :  { %580 = shalt.err (!%p577_p9)
}
  0x33   :  { %50 = dma.hbm_to_vmem [thread:$0]  %s748_s3, 1024, %s45_s21, [#allocation6], %s610_s28, %s610_s28, %s611_s29  }
  0x34   :  { %603 = dma.done.wait [#allocation3], 1024  }
  0x35   :  { %604 = vsyncadd [#allocation3], 4294966272 }
  0x36   :  { %605 = dma.done.wait [#allocation6], 2048  }
  0x37   :  { %606 = vsyncadd [#allocation6], 4294965248  ;;  %v499_v0 = vld [vmem:[#allocation5] sm:$0xff]   ;;  %v500_v1 = vld [vmem:[#allocation5 + $0x8] sm:$0xff]  }
  0x38   :  { %443 = vmatprep.subr.bf16.mxu0 %v499_v0  ;;  %v501_v2 = vld [vmem:[#allocation5 + $0x10] sm:$0xff]   ;;  %v502_v3 = vld [vmem:[#allocation5 + $0x18] sm:$0xff]   ;;  %v692_v4 = vld [vmem:[#allocation2] sm:$0xff] }
  0x39   :  { %444 = vmatpush3.bf16.msra.mxu0 %v499_v0  ;;  %v694_v5 = vld [vmem:[#allocation2 + $0x8] sm:$0xff]  ;;  %v503_v7 = vld [vmem:[#allocation5 + $0x20] sm:$0xff]   ;;  %v509_v10 = vld [vmem:[#allocation7 + $0x10] sm:$0xff]  }
  0x3a   :  { %445 = vmatprep.subr.bf16.mxu0 %v500_v1  ;;  %v71_v6 = vpack.c.bf16 %v694_v5, %v692_v4  ;;  %v507_v8 = vld [vmem:[#allocation7] sm:$0xff]   ;;  %v508_v9 = vld [vmem:[#allocation7 + $0x8] sm:$0xff]   ;;  %v510_v12 = vld [vmem:[#allocation7 + $0x18] sm:$0xff]  }
  0x3b   :  { %467 = vmatprep.subr.bf16.mxu1 %v507_v8  ;;  %v504_v11 = vld [vmem:[#allocation5 + $0x28] sm:$0xff]   ;;  %v505_v13 = vld [vmem:[#allocation5 + $0x30] sm:$0xff]   ;;  %v511_v14 = vld [vmem:[#allocation7 + $0x20] sm:$0xff]  }
  0x3c   :  { %459 = vmatprep.mubr.bf16.mxu0 %v71_v6  ;;  %468 = vmatpush3.bf16.msra.mxu1 %v507_v8  ;;  %v506_v15 = vld [vmem:[#allocation5 + $0x38] sm:$0xff]   ;;  %v698_v16 = vld [vmem:[#allocation2 + $0x10] sm:$0xff]  ;;  %v512_v18 = vld [vmem:[#allocation7 + $0x28] sm:$0xff]  }
  0x3d   :  { %446 = vmatpush3.bf16.msra.mxu0 %v500_v1  ;;  %469 = vmatprep.subr.bf16.mxu1 %v508_v9  ;;  %v700_v17 = vld [vmem:[#allocation2 + $0x18] sm:$0xff]  ;;  %v702_v19 = vld [vmem:[#allocation2 + $0x20] sm:$0xff]  ;;  %v704_v20 = vld [vmem:[#allocation2 + $0x28] sm:$0xff] }
  0x3e   :  { %447 = vmatprep.subr.bf16.mxu0 %v501_v2  ;;  %v72_v21 = vpack.c.bf16 %v700_v17, %v698_v16  ;;  %v73_v22 = vpack.c.bf16 %v704_v20, %v702_v19  ;;  %v710_v23 = vld [vmem:[#allocation2 + $0x30] sm:$0xff]  ;;  %v712_v24 = vld [vmem:[#allocation2 + $0x38] sm:$0xff]  ;;  %v401_v28 = vld [vmem:[%s747_s2] ss:$0 sm:$0xff] }
  0x3f   :  { %v74_v25 = vpack.c.bf16 %v712_v24, %v710_v23  ;;  %v513_v26 = vld [vmem:[#allocation7 + $0x30] sm:$0xff]   ;;  %v514_v27 = vld [vmem:[#allocation7 + $0x38] sm:$0xff]   ;;  %v410_v57 = vld [vmem:[%s749_s4] ss:$0 sm:$0xff]  ;;  %s616_s4 = smov [#allocation8]  }
  0x40   :  { %470 = vmatpush3.bf16.msra.mxu1 %v508_v9  ;;  %s388_s8 = sshll.u32 %s616_s4, 4  ;;  %s389_s8 = int_to_ptr.vmem [resolvable:$true] %s388_s8 }
  0x41   :  { %448 = vmatpush3.bf16.msra.mxu0 %v501_v2  ;;  %471 = vmatprep.subr.bf16.mxu1 %v509_v10  ;;  %s581_s9 = scalar_lea.vmem %s389_s8, 1024  ;;  %p586_p11 = scmp.lt.s32.totalorder %s389_s8, %s389_s8 }
  0x42   :  { %449 = vmatprep.subr.bf16.mxu0 %v502_v3  ;;  %p582_p10 = scmp.ne.s32.totalorder %s389_s8, %s581_s9  ;;  %p587_p12 = scmp.lt.s32.totalorder %s581_s9, %s581_s9 }
  0x44   :  { %472 = vmatpush3.bf16.msra.mxu1 %v509_v10  ;;  %p588_p13 = por %p587_p12, %p586_p11 }
  0x45   :  { %450 = vmatpush3.bf16.msra.mxu0 %v502_v3  ;;  %473 = vmatprep.subr.bf16.mxu1 %v510_v12 }
  0x46   :  { %451 = vmatprep.subr.bf16.mxu0 %v503_v7  ;;  %p589_p0 = pnand %p588_p13, %p582_p10 }
  0x48   :  { %474 = vmatpush3.bf16.msra.mxu1 %v510_v12 }
  0x49   :  { %452 = vmatpush3.bf16.msra.mxu0 %v503_v7  ;;  %475 = vmatprep.subr.bf16.mxu1 %v511_v14 }
  0x4a   :  { %453 = vmatprep.subr.bf16.mxu0 %v504_v11 }
  0x4c   :  { %476 = vmatpush3.bf16.msra.mxu1 %v511_v14 }
  0x4d   :  { %454 = vmatpush3.bf16.msra.mxu0 %v504_v11  ;;  %477 = vmatprep.subr.bf16.mxu1 %v512_v18 }
  0x4e   :  { %455 = vmatprep.subr.bf16.mxu0 %v505_v13 }
  0x50   :  { %478 = vmatpush3.bf16.msra.mxu1 %v512_v18 }
  0x51   :  { %456 = vmatpush3.bf16.msra.mxu0 %v505_v13  ;;  %479 = vmatprep.subr.bf16.mxu1 %v513_v26 }
  0x52   :  { %457 = vmatprep.subr.bf16.mxu0 %v506_v15 }
  0x54   :  { %480 = vmatpush3.bf16.msra.mxu1 %v513_v26 }
  0x55   :  { %458 = vmatpush3.bf16.msra.mxu0 %v506_v15  ;;  %481 = vmatprep.subr.bf16.mxu1 %v514_v27 }
  0x58   :  { %460 = vmatmul.mubr.bf16.vlgmr.msra.gmra.mrb[0].mxu0 %v72_v21  ;;  %482 = vmatpush3.bf16.msra.mxu1 %v514_v27 }
  0x59   :  { %463 = vmatprep.mubr.bf16.mxu0 %v73_v22 }
  0x60   :  { %464 = vmatmul.mubr.bf16.gmra.mrb[4].mxu0 %v74_v25 }
 0x12b   :  { %v461_v29 = vpop.f32.mrb[0].mxu0 }
 0x12c   :  { %v189_v30 = vadd.f32 %v461_v29, %v401_v28  ;;  %v180_v31 = vpop.f32.mrb[1].mxu0 }
 0x12d   :  { %v181_v32 = vadd.f32 %v401_v28, %v180_v31  ;;  %v462_v33 = vpop.f32.mrb[2].mxu0 }
 0x12e   :  { %v192_v34 = vadd.f32 %v462_v33, %v401_v28  ;;  %v183_v35 = vpop.f32.mrb[3].mxu0  ;;  %v213_v37 = vmax.f32 %v189_v30, 0.0 }
 0x12f   :  { %v184_v36 = vadd.f32 %v401_v28, %v183_v35  ;;  %v211_v39 = vmax.f32 %v181_v32, 0.0 }
 0x130   :  { %v214_v38 = vmax.f32 %v192_v34, 0.0 }
 0x131   :  { %v212_v40 = vmax.f32 %v184_v36, 0.0 }
 0x132   :  { %v220_v41 = vpack.c.bf16 %v214_v38, %v213_v37 }
 0x133   :  { %v465_v42 = vpop.f32.mrb[4].mxu0  ;;  %v219_v43 = vpack.c.bf16 %v212_v40, %v211_v39 }
 0x134   :  { %v205_v44 = vadd.f32 %v465_v42, %v401_v28  ;;  %v196_v45 = vpop.f32.mrb[5].mxu0 }
 0x135   :  { %v197_v46 = vadd.f32 %v401_v28, %v196_v45  ;;  %v466_v47 = vpop.f32.mrb[6].mxu0  ;;  %483 = vmatprep.mubr.bf16.mxu1 %v219_v43 }
 0x136   :  { %v208_v48 = vadd.f32 %v466_v47, %v401_v28  ;;  %v199_v49 = vpop.f32.mrb[7].mxu0  ;;  %484 = vmatmul.mubr.bf16.vlgmr.msra.gmra.mrb[0].mxu1 %v220_v41  ;;  %v217_v51 = vmax.f32 %v205_v44, 0.0 }
 0x137   :  { %v200_v50 = vadd.f32 %v401_v28, %v199_v49  ;;  %v215_v53 = vmax.f32 %v197_v46, 0.0 }
 0x138   :  { %v218_v52 = vmax.f32 %v208_v48, 0.0 }
 0x139   :  { %v216_v54 = vmax.f32 %v200_v50, 0.0 }
 0x13a   :  { %v222_v55 = vpack.c.bf16 %v218_v52, %v217_v51 }
 0x13b   :  { %v221_v56 = vpack.c.bf16 %v216_v54, %v215_v53 }
 0x13d   :  { %487 = vmatprep.mubr.bf16.mxu1 %v221_v56 }
 0x13e   :  { %488 = vmatmul.mubr.bf16.gmra.mrb[4].mxu1 %v222_v55 }
 0x209   :  { %v485_v58 = vpop.f32.mrb[0].mxu1 }
 0x20a   :  { %v337_v59 = vadd.f32 %v485_v58, %v410_v57  ;;  %v328_v60 = vpop.f32.mrb[1].mxu1 }
 0x20b   :  { %v329_v61 = vadd.f32 %v410_v57, %v328_v60  ;;  %v486_v62 = vpop.f32.mrb[2].mxu1 }
 0x20c   :  { %v361_v63 = vmax.f32 %v337_v59, 0.0  ;;  %v340_v0 = vadd.f32 %v486_v62, %v410_v57  ;;  %v331_v1 = vpop.f32.mrb[3].mxu1 }
 0x20d   :  { %v359_v2 = vmax.f32 %v329_v61, 0.0  ;;  %v332_v3 = vadd.f32 %v410_v57, %v331_v1 }
 0x20e   :  { %v369_v6 = vadd.f32 %v361_v63, %v698_v16  ;;  %v362_v7 = vmax.f32 %v340_v0, 0.0 }
 0x20f   :  { %v367_v8 = vadd.f32 %v359_v2, %v692_v4  ;;  %v360_v9 = vmax.f32 %v332_v3, 0.0 }
 0x210   :  { %377 = vst [vmem:[#allocation8 + $0x10] sm:$0xff] %v369_v6  ;;  %v370_v10 = vadd.f32 %v362_v7, %v700_v17 }
 0x211   :  { %375 = vst [vmem:[#allocation8] sm:$0xff] %v367_v8  ;;  %v368_v11 = vadd.f32 %v360_v9, %v694_v5  ;;  %v489_v12 = vpop.f32.mrb[4].mxu1 }
 0x212   :  { %378 = vst [vmem:[#allocation8 + $0x18] sm:$0xff] %v370_v10  ;;  %v353_v13 = vadd.f32 %v489_v12, %v410_v57  ;;  %v344_v14 = vpop.f32.mrb[5].mxu1 }
 0x213   :  { %376 = vst [vmem:[#allocation8 + $0x8] sm:$0xff] %v368_v11  ;;  %v345_v15 = vadd.f32 %v410_v57, %v344_v14  ;;  %v490_v18 = vpop.f32.mrb[6].mxu1 }
 0x214   :  { %v365_v21 = vmax.f32 %v353_v13, 0.0  ;;  %v356_v22 = vadd.f32 %v490_v18, %v410_v57  ;;  %v347_v16 = vpop.f32.mrb[7].mxu1 }
 0x215   :  { %v363_v25 = vmax.f32 %v345_v15, 0.0  ;;  %v348_v26 = vadd.f32 %v410_v57, %v347_v16 }
 0x216   :  { %v373_v4 = vadd.f32 %v365_v21, %v710_v23  ;;  %v366_v27 = vmax.f32 %v356_v22, 0.0 }
 0x217   :  { %v371_v17 = vadd.f32 %v363_v25, %v702_v19  ;;  %v364_v5 = vmax.f32 %v348_v26, 0.0 }
 0x218   :  { %381 = vst [vmem:[#allocation8 + $0x30] sm:$0xff] %v373_v4  ;;  %v374_v28 = vadd.f32 %v366_v27, %v712_v24 }
 0x219   :  { %379 = vst [vmem:[#allocation8 + $0x20] sm:$0xff] %v371_v17  ;;  %v372_v29 = vadd.f32 %v364_v5, %v704_v20 }
 0x21a   :  { %382 = vst [vmem:[#allocation8 + $0x38] sm:$0xff] %v374_v28 }
 0x21b   :  { %380 = vst [vmem:[#allocation8 + $0x28] sm:$0xff] %v372_v29 }
 0x21c   :  { %592 = shalt.err (!%p589_p0)
}
 0x21d   :  { %s593_s12 = scalar_lea.hbm %s750_s5, 1024 }
 0x21e   :  { %p594_p1 = scmp.ne.s32.totalorder %s750_s5, %s593_s12  ;;  %p597_p2 = scmp.lt.u32.totalorder %s593_s12, %s750_s5 }
 0x220   :  { %p599_p3 = pnand %p597_p2, %p594_p1 }
 0x222   :  { %602 = shalt.err (!%p599_p3)
}
 0x223   :  { %394 = dma.vmem_to_hbm [thread:$0]  %s389_s8, 1024, %s750_s5, [#allocation4], %s613_s1, %s613_s1, %s614_s17  }
 0x224   :  { %607 = dma.done.wait [#allocation4], 1024  }
 0x225   :  { %608 = vsyncadd [#allocation4], 4294966272 }
 0x226   :  { %398 = vsyncpa [#allocation3], 1 }
 0x227   :  { %399 = vsyncpa [#allocation6], 1 }
 0x228   :  { %400 = vsyncpa [#allocation4], 1 }

</bundles_post_ra>
